<compile_context>
chip_gen: v7x
topology: tpu7x:2x2x1
jax: 0.10.0
libtpu: 0.0.40
codegen_flags: <defaults>
</compile_context>

<pallas_src>
import functools

import jax
import jax.numpy as jnp
from jax.experimental import pallas as pl
from jax.experimental.pallas import tpu as pltpu

N_LIST = [2, 50, 50, 50, 1]
_HPAD = 64                 # padded hidden width (tile/lane friendly)
_CONST_ROW = N_LIST[1]     # row 50 carries the constant 1 used for bias folding
_MAX_TILE = 16384          # max lanes per grid step; (64, 16384) f32 slab = 4 MiB
assert _CONST_ROW < _HPAD


def _round_up(x, m):
    return ((x + m - 1) // m) * m


def _choose_tile(B):
    """Pick a lane-tile: big enough to amortize per-step overhead, >=2 steps
    when B >= 256 (v7x megacore), and no gross padding blow-up."""
    B128 = _round_up(B, 128)
    if B128 <= 128:
        return 128
    if B128 <= 2 * _MAX_TILE:
        return max(128, _round_up(pl.cdiv(B128, 2), 128))
    n_steps = pl.cdiv(B128, _MAX_TILE)
    n_steps += n_steps % 2  # even step count keeps both v7x TCs fed
    return min(_MAX_TILE, max(128, _round_up(pl.cdiv(B128, n_steps), 128)))


def _mlp_kernel(x_ref, wbig_ref, wsmall_ref, o_ref, *, mxu_dtype):
    # x_ref: (2, bt) -- batch on the lane axis.  Hidden activations: (64, bt).
    x0 = x_ref[0:1, :]                       # (1, bt)
    x1 = x_ref[1:2, :]                       # (1, bt)

    w0a = wsmall_ref[:, 0:1]                 # (64, 1) layer-0 weight col 0
    w0b = wsmall_ref[:, 1:2]                 # (64, 1) layer-0 weight col 1
    b0 = wsmall_ref[:, 2:3]                  # (64, 1) layer-0 bias, row 50 == 1.0
    w3 = wsmall_ref[:, 3:4]                  # (64, 1) head weights, row 50 == b3

    # Layer 0: Linear(2, 50) + ReLU as two VPU broadcast FMAs (K=2 on the MXU
    # would be pure push/pop latency).  Row 50 becomes the constant 1 that
    # carries the folded b1/b2/b3 through the remaining layers.
    h = jnp.maximum(w0a * x0 + w0b * x1 + b0, 0.0)       # (64, bt) f32

    # Layers 1 & 2: Linear(50, 50) + ReLU on the MXU (padded to 64x64); biases
    # folded into column 50, constant row preserved via w[50, 50] == 1.
    w1 = wbig_ref[0]
    w2 = wbig_ref[1]
    h = jnp.maximum(
        jnp.dot(w1, h.astype(mxu_dtype), preferred_element_type=jnp.float32), 0.0)
    h = jnp.maximum(
        jnp.dot(w2, h.astype(mxu_dtype), preferred_element_type=jnp.float32), 0.0)

    # Output head: Linear(50, 1), b3 folded into row 50 of w3.  N=1 on the MXU
    # wastes the result columns, so use a VPU multiply + sublane (XLU) reduce;
    # the result is already a lane-dense (1, bt) row.
    # (If a bundle dump shows VALU binding instead of vmatmul, this head could
    #  move to the MXU as a (1,64)@(64,bt) dot -- left on the VPU here.)
    o_ref[...] = jnp.sum(w3 * h, axis=0, keepdims=True).astype(o_ref.dtype)


def _prepare_packed_params(params, mxu_dtype):
    """Pack PyTorch-layout params (W: (out,in), b: (out,)) into two arrays:
    w_big (2, 64, 64) with b1/b2 folded in, and w_small (64, 4) holding the
    layer-0 columns, the layer-0 bias (+ constant-1 row) and the head column
    (+ folded b3)."""
    (W0, b0), (W1, b1), (W2, b2), (W3, b3) = params
    H = _HPAD
    f32 = jnp.float32

    w_small = jnp.zeros((H, 4), f32)
    w_small = w_small.at[: W0.shape[0], 0:2].set(W0.astype(f32))
    w_small = w_small.at[: b0.shape[0], 2].set(b0.astype(f32))
    w_small = w_small.at[_CONST_ROW, 2].set(1.0)              # constant-1 row
    w_small = w_small.at[: W3.shape[1], 3].set(W3[0, :].astype(f32))
    w_small = w_small.at[_CONST_ROW, 3].set(b3.astype(f32)[0])  # b3 folded

    def fold(W, b):
        w = jnp.zeros((H, H), f32)
        w = w.at[: W.shape[0], : W.shape[1]].set(W.astype(f32))
        w = w.at[: b.shape[0], _CONST_ROW].set(b.astype(f32))  # bias column
        w = w.at[_CONST_ROW, _CONST_ROW].set(1.0)              # keep constant row
        return w

    w_big = jnp.stack([fold(W1, b1), fold(W2, b2)]).astype(mxu_dtype)
    return w_big, w_small


@functools.partial(jax.jit,
                   static_argnames=("batch_tile", "mxu_dtype", "transposed_input"))
def shared_model_forward(x, params, *, batch_tile=None, mxu_dtype=jnp.float32,
                         transposed_input=False):
    """Forward pass of SharedModel.

    x: (B, 2) float32 (or (2, B) if transposed_input=True).
    params: PyTorch-layout [(W(out,in), b(out,)), ...] for the 4 Linear layers.
    Returns (B, 1) float32.
    """
    if transposed_input:
        d_in, B = x.shape
    else:
        B, d_in = x.shape
    assert d_in == N_LIST[0], "SharedModel expects 2 input features"

    if batch_tile is None:
        bt = _choose_tile(B)
    else:
        bt = max(128, _round_up(batch_tile, 128))
        bt = min(bt, _round_up(B, 128))
    B_pad = _round_up(B, bt)

    x = x.astype(jnp.float32)
    if transposed_input:
        x_t = x if B_pad == B else jnp.pad(x, ((0, 0), (0, B_pad - B)))
    else:
        # pad fuses into the single transpose copy; skipped when B is aligned
        xp = x if B_pad == B else jnp.pad(x, ((0, B_pad - B), (0, 0)))
        x_t = xp.T                                            # (2, B_pad) lane-dense

    w_big, w_small = _prepare_packed_params(params, mxu_dtype)

    grid = (B_pad // bt,)
    n_h = N_LIST[1]
    cost = pl.CostEstimate(
        flops=2 * B_pad * (d_in * n_h + 2 * n_h * n_h + n_h),
        transcendentals=0,
        bytes_accessed=(x_t.size + B_pad) * 4
        + int(w_big.size) * w_big.dtype.itemsize + int(w_small.size) * 4,
    )

    # Per-step footprint: double-buffered x/out tiles + resident weights + a few
    # live (64, bt) activation slabs.  Clamp to >= 32 MiB so v5e's 16 MiB scoped
    # default never truncates the big-tile schedule; stay well under v7x's
    # 64 MiB physical VMEM.
    est = 6 * _HPAD * bt * 4 + 4 * (d_in + 1) * bt * 4 + (1 << 20)
    vmem_limit = int(min(64 * 1024 * 1024, max(32 * 1024 * 1024, est)))

    kernel = functools.partial(_mlp_kernel, mxu_dtype=mxu_dtype)
    out_row = pl.pallas_call(
        kernel,
        out_shape=jax.ShapeDtypeStruct((1, B_pad), jnp.float32),
        grid_spec=pltpu.PrefetchScalarGridSpec(
            num_scalar_prefetch=0,
            grid=grid,
            in_specs=[
                pl.BlockSpec((d_in, bt), lambda i: (0, i)),          # x tile
                pl.BlockSpec((2, _HPAD, _HPAD), lambda i: (0, 0, 0)),  # w1/w2 resident
                pl.BlockSpec((_HPAD, 4), lambda i: (0, 0)),          # small params
            ],
            out_specs=pl.BlockSpec((1, bt), lambda i: (0, i)),       # lane-dense out
        ),
        compiler_params=pltpu.CompilerParams(
            dimension_semantics=("parallel",),
            vmem_limit_bytes=vmem_limit),
        cost_estimate=cost,
    )(x_t, w_big, w_small)

    out = out_row[0]
    if B_pad != B:
        out = out[:B]
    return out[:, None]                                             # (B, 1)


def init_params(key, nlist=N_LIST):
    """PyTorch nn.Linear-style params: W is (out, in), b is (out,)."""
    params = []
    for d_in, d_out in zip(nlist[:-1], nlist[1:]):
        key, kw, kb = jax.random.split(key, 3)
        bound = 1.0 / (d_in ** 0.5)
        W = jax.random.uniform(kw, (d_out, d_in), jnp.float32, -bound, bound)
        b = jax.random.uniform(kb, (d_out,), jnp.float32, -bound, bound)
        params.append((W, b))
    return params


def reference_forward(x, params):
    h = x
    for W, b in params[:-1]:
        h = jnp.maximum(h @ W.T + b, 0.0)
    W, b = params[-1]
    return h @ W.T + b


if __name__ == "__main__":
    key = jax.random.PRNGKey(0)
    key, kx = jax.random.split(key)
    params = init_params(key)

    # Small batch -> single 128-lane tile.
    B = 16
    x = jax.random.normal(kx, (B, N_LIST[0]), jnp.float32)
    out = jax.block_until_ready(shared_model_forward(x, params))
    ref = reference_forward(x, params)
    assert out.shape == (B, N_LIST[-1])
    assert jnp.allclose(out, ref, atol=1e-4, rtol=1e-4), "f32 small-batch mismatch"

    # Ragged batch -> multi-step "parallel" grid with padded tail (bt=256, 2 steps).
    key, kx2 = jax.random.split(key)
    B2 = 400
    x2 = jax.random.normal(kx2, (B2, N_LIST[0]), jnp.float32)
    out2 = jax.block_until_ready(shared_model_forward(x2, params))
    ref2 = reference_forward(x2, params)
    assert out2.shape == (B2, N_LIST[-1])
    assert jnp.allclose(out2, ref2, atol=1e-4, rtol=1e-4), "f32 ragged-batch mismatch"

    # Pre-transposed (2, B) input path skips the wrapper transpose copy.
    out2t = jax.block_until_ready(
        shared_model_forward(x2.T, params, transposed_input=True))
    assert jnp.allclose(out2t, ref2, atol=1e-4, rtol=1e-4), "transposed-input mismatch"

    # Optional bf16 MXU operands (v6e/v7x recommendation); f32 accumulation,
    # tolerance loosened accordingly vs. the f32 reference.
    out2_bf16 = jax.block_until_ready(
        shared_model_forward(x2, params, mxu_dtype=jnp.bfloat16))
    assert jnp.allclose(out2_bf16, ref2, atol=5e-2, rtol=5e-2), "bf16 MXU mismatch"

    print("KERNEL_OK")
</pallas_src>

<mosaic_0001>
module attributes {stable_mosaic.version = 11 : i64} {
  func.func @_mlp_kernel(%arg0: i32, %arg1: memref<2x128xf32, #tpu.memory_space<vmem>>, %arg2: memref<2x64x64xf32, #tpu.memory_space<vmem>>, %arg3: memref<64x4xf32, #tpu.memory_space<vmem>>, %arg4: memref<1x128xf32, #tpu.memory_space<vmem>>) attributes {dimension_semantics = [#tpu.dimension_semantics<parallel>], iteration_bounds = array<i64: 1>, scalar_prefetch = 0 : i64, scratch_operands = 0 : i64, tpu.core_type = #tpu.core_type<tc>, window_params = [{transform_indices = @transform_0, window_bounds = array<i64: 2, 128>}, {pipeline_mode = #tpu.pipeline_mode<synchronous>, transform_indices = @transform_1, window_bounds = array<i64: 2, 64, 64>}, {pipeline_mode = #tpu.pipeline_mode<synchronous>, transform_indices = @transform_2, window_bounds = array<i64: 64, 4>}, {transform_indices = @transform_3, window_bounds = array<i64: 1, 128>}]} {
    %c0 = arith.constant 0 : index
    %c0_0 = arith.constant 0 : index
    %0 = vector.load %arg1[%c0, %c0_0] : memref<2x128xf32, #tpu.memory_space<vmem>>, vector<1x128xf32>
    %c1 = arith.constant 1 : index
    %c0_1 = arith.constant 0 : index
    %1 = vector.load %arg1[%c1, %c0_1] : memref<2x128xf32, #tpu.memory_space<vmem>>, vector<1x128xf32>
    %c0_2 = arith.constant 0 : index
    %c0_3 = arith.constant 0 : index
    %2 = vector.load %arg3[%c0_2, %c0_3] : memref<64x4xf32, #tpu.memory_space<vmem>>, vector<64x1xf32>
    %c0_4 = arith.constant 0 : index
    %c1_5 = arith.constant 1 : index
    %3 = vector.load %arg3[%c0_4, %c1_5] : memref<64x4xf32, #tpu.memory_space<vmem>>, vector<64x1xf32>
    %c0_6 = arith.constant 0 : index
    %c2 = arith.constant 2 : index
    %4 = vector.load %arg3[%c0_6, %c2] : memref<64x4xf32, #tpu.memory_space<vmem>>, vector<64x1xf32>
    %c0_7 = arith.constant 0 : index
    %c3 = arith.constant 3 : index
    %5 = vector.load %arg3[%c0_7, %c3] : memref<64x4xf32, #tpu.memory_space<vmem>>, vector<64x1xf32>
    %6 = vector.broadcast %2 : vector<64x1xf32> to vector<64x128xf32>
    %7 = vector.broadcast %0 : vector<1x128xf32> to vector<64x128xf32>
    %8 = arith.mulf %6, %7 : vector<64x128xf32>
    %9 = vector.broadcast %3 : vector<64x1xf32> to vector<64x128xf32>
    %10 = vector.broadcast %1 : vector<1x128xf32> to vector<64x128xf32>
    %11 = arith.mulf %9, %10 : vector<64x128xf32>
    %12 = arith.addf %8, %11 : vector<64x128xf32>
    %13 = vector.broadcast %4 : vector<64x1xf32> to vector<64x128xf32>
    %14 = arith.addf %12, %13 : vector<64x128xf32>
    %cst = arith.constant 0.000000e+00 : f32
    %15 = vector.broadcast %cst : f32 to vector<64x128xf32>
    %16 = arith.maximumf %14, %15 : vector<64x128xf32>
    %c0_8 = arith.constant 0 : index
    %c0_9 = arith.constant 0 : index
    %c0_10 = arith.constant 0 : index
    %17 = vector.load %arg2[%c0_8, %c0_9, %c0_10] : memref<2x64x64xf32, #tpu.memory_space<vmem>>, vector<1x64x64xf32>
    %18 = vector.shape_cast %17 : vector<1x64x64xf32> to vector<64x64xf32>
    %c1_11 = arith.constant 1 : index
    %c0_12 = arith.constant 0 : index
    %c0_13 = arith.constant 0 : index
    %19 = vector.load %arg2[%c1_11, %c0_12, %c0_13] : memref<2x64x64xf32, #tpu.memory_space<vmem>>, vector<1x64x64xf32>
    %20 = vector.shape_cast %19 : vector<1x64x64xf32> to vector<64x64xf32>
    %cst_14 = arith.constant dense<0.000000e+00> : vector<64x128xf32>
    %21 = tpu.matmul %18, %16, %cst_14 {dimension_numbers = #tpu.dot_dimension_numbers<[1], [0], [0], [1], [0, 0, 1, 1], [], []>} : vector<64x64xf32>, vector<64x128xf32>, vector<64x128xf32> -> vector<64x128xf32>
    %cst_15 = arith.constant 0.000000e+00 : f32
    %22 = vector.broadcast %cst_15 : f32 to vector<64x128xf32>
    %23 = arith.maximumf %21, %22 : vector<64x128xf32>
    %cst_16 = arith.constant dense<0.000000e+00> : vector<64x128xf32>
    %24 = tpu.matmul %20, %23, %cst_16 {dimension_numbers = #tpu.dot_dimension_numbers<[1], [0], [0], [1], [0, 0, 1, 1], [], []>} : vector<64x64xf32>, vector<64x128xf32>, vector<64x128xf32> -> vector<64x128xf32>
    %cst_17 = arith.constant 0.000000e+00 : f32
    %25 = vector.broadcast %cst_17 : f32 to vector<64x128xf32>
    %26 = arith.maximumf %24, %25 : vector<64x128xf32>
    %27 = vector.broadcast %5 : vector<64x1xf32> to vector<64x128xf32>
    %28 = arith.mulf %27, %26 : vector<64x128xf32>
    %cst_18 = arith.constant dense<0.000000e+00> : vector<128xf32>
    %29 = vector.multi_reduction <add>, %28, %cst_18 [0] : vector<64x128xf32> to vector<128xf32>
    %30 = vector.shape_cast %29 : vector<128xf32> to vector<1x128xf32>
    %c0_19 = arith.constant 0 : index
    %c0_20 = arith.constant 0 : index
    %31 = vector.load %arg4[%c0_19, %c0_20] : memref<1x128xf32, #tpu.memory_space<vmem>>, vector<1x128xf32>
    tpu.vector_store %arg4[%c0_19, %c0_20], %30 {strides = array<i32>} : memref<1x128xf32, #tpu.memory_space<vmem>>, vector<1x128xf32>,
    return
  }
  func.func @transform_0(%arg0: i32) -> (i32, i32) {
    %c0_i32 = arith.constant 0 : i32
    %c0_i32_0 = arith.constant 0 : i32
    return %c0_i32, %arg0 : i32, i32
  }
  func.func @transform_1(%arg0: i32) -> (i32, i32, i32) {
    %c0_i32 = arith.constant 0 : i32
    %c0_i32_0 = arith.constant 0 : i32
    %c0_i32_1 = arith.constant 0 : i32
    %c0_i32_2 = arith.constant 0 : i32
    return %c0_i32, %c0_i32_0, %c0_i32_1 : i32, i32, i32
  }
  func.func @transform_2(%arg0: i32) -> (i32, i32) {
    %c0_i32 = arith.constant 0 : i32
    %c0_i32_0 = arith.constant 0 : i32
    %c0_i32_1 = arith.constant 0 : i32
    return %c0_i32, %c0_i32_0 : i32, i32
  }
  func.func @transform_3(%arg0: i32) -> (i32, i32) {
    %c0_i32 = arith.constant 0 : i32
    %c0_i32_0 = arith.constant 0 : i32
    return %c0_i32, %arg0 : i32, i32
  }
}

</mosaic_0001>

<bundles_post_ra>
// kernel: shared_model_forward.1
= control target key start
LH: loop header
LB: loop body
LE: loop exit
PB: predicated region body
PF: predicated region fallthrough
CT: control target
= control target key end

     0   :  { %v691_v0 = vmov 1   ;;  %v692_v1 = vmov 0   ;;  %v693_v7 = vmov 2   ;;  %vm193_vm0 = vcmask 523264   ;;  %s860_s2 = inlined_call_operand.vmem [shape: f32[64,4], index: 2, kind: input, shape index: {}]   ;;  %s861_s1 = inlined_call_operand.vmem [shape: f32[2,64,64], index: 1, kind: input, shape index: {}]   ;;  %s862_s0 = inlined_call_operand.vmem [shape: f32[2,128], index: 0, kind: input, shape index: {}]   ;;  %s863_s3 = inlined_call_operand.vmem [shape: f32[1,128], index: 3, kind: output, shape index: {}]  }
   0x1   :  { %677 = vset.pattern.permute.xlu1 %v691_v0  ;;  %676 = vset.pattern.permute.xlu0 %v692_v1  ;;  %v718_v2 = vld [vmem:[%s860_s2] sm:$0xff]  ;;  %v725_v3 = vld [vmem:[%s860_s2 + $0x8] sm:$0xff]  ;;  %v732_v4 = vld [vmem:[%s860_s2 + $0x10] sm:$0xff] }
   0x2   :  { %77 = vperm.xlu1 %677, %v718_v2   ;;  %26 = vperm.xlu0 %676, %v718_v2   ;;  %v737_v5 = vld [vmem:[%s860_s2 + $0x18] sm:$0xff]  ;;  %v746_v6 = vld [vmem:[%s860_s2 + $0x20] sm:$0xff]  ;;  %v752_v8 = vld [vmem:[%s860_s2 + $0x30] sm:$0xff] }
   0x3   :  { %v760_v9 = vld [vmem:[%s860_s2 + $0x28] sm:$0xff]  ;;  %v772_v10 = vld [vmem:[%s860_s2 + $0x38] sm:$0xff]  ;;  %v176_v11 = vld [vmem:[%s861_s1] sm:$0xff] }
   0x4   :  { %600 = vmatprep.mubr.msk.f32.mxu0 %vm193_vm0, %v176_v11  ;;  %v527_v20 = vld [vmem:[%s862_s0 + $0x1] ss:$0 sm:$0xff]  ;;  %v526_v21 = vld [vmem:[%s862_s0] ss:$0 sm:$0xff] }
   0x6   :  { %81 = vperm.xlu1 %677, %v725_v3   ;;  %31 = vperm.xlu0 %676, %v725_v3  }
   0xa   :  { %678 = vset.pattern.permute.xlu1 %v692_v1  ;;  %36 = vperm.xlu0 %676, %v732_v4  }
   0xb   :  { %41 = vperm.xlu1 %678, %v737_v5  }
   0xe   :  { %679 = vset.pattern.permute.xlu0 %v691_v0 }
   0xf   :  { %680 = vset.pattern.permute.xlu1 %v691_v0  ;;  %85 = vperm.xlu0 %679, %v732_v4  }
  0x10   :  { %89 = vperm.xlu1 %680, %v737_v5  }
  0x13   :  { %93 = vperm.xlu0 %679, %v746_v6  }
  0x14   :  { %681 = vset.pattern.permute.xlu1 %v693_v7 }
  0x15   :  { %129 = vperm.xlu1 %681, %v718_v2  }
  0x17   :  { %101 = vperm.xlu0 %679, %v752_v8  }
  0x19   :  { %682 = vset.pattern.permute.xlu1 %v692_v1 }
  0x1a   :  { %46 = vperm.xlu1 %682, %v746_v6  }
  0x1b   :  { %686 = vset.pattern.permute.xlu0 %v693_v7 }
  0x1c   :  { %133 = vperm.xlu0 %686, %v725_v3  }
  0x1e   :  { %51 = vperm.xlu1 %682, %v760_v9  }
  0x20   :  { %141 = vperm.xlu0 %686, %v737_v5  }
  0x22   :  { %683 = vset.pattern.permute.xlu1 %v691_v0 }
  0x23   :  { %97 = vperm.xlu1 %683, %v760_v9  }
  0x24   :  { %149 = vperm.xlu0 %686, %v760_v9  }
  0x27   :  { %684 = vset.pattern.permute.xlu1 %v693_v7 }
  0x28   :  { %137 = vperm.xlu1 %684, %v732_v4  }
  0x2c   :  { %685 = vset.pattern.permute.xlu1 %v692_v1 }
  0x2d   :  { %56 = vperm.xlu1 %685, %v752_v8  }
  0x31   :  { %61 = vperm.xlu1 %685, %v772_v10  }
  0x35   :  { %687 = vset.pattern.permute.xlu1 %v691_v0 }
  0x36   :  { %105 = vperm.xlu1 %687, %v772_v10  }
  0x3a   :  { %688 = vset.pattern.permute.xlu1 %v693_v7 }
  0x3b   :  { %145 = vperm.xlu1 %688, %v746_v6  }
  0x3f   :  { %153 = vperm.xlu1 %688, %v752_v8  }
  0x43   :  { %157 = vperm.xlu1 %688, %v772_v10  }
  0x81   :  { %v78_v12 = vpop.permute.xlu1 %77  ;;  %v27_v13 = vpop.permute.xlu0 %26 }
  0x82   :  { %v112_v23 = vmul.f32 %v527_v20, %v78_v12  ;;  %v68_v24 = vmul.f32 %v526_v21, %v27_v13 }
  0x84   :  { %v120_v29 = vadd.f32 %v112_v23, %v68_v24 }
  0x85   :  { %v82_v14 = vpop.permute.xlu1 %81  ;;  %v32_v15 = vpop.permute.xlu0 %31 }
  0x86   :  { %v113_v26 = vmul.f32 %v527_v20, %v82_v14  ;;  %v69_v27 = vmul.f32 %v526_v21, %v32_v15 }
  0x88   :  { %v121_v32 = vadd.f32 %v113_v26, %v69_v27 }
  0x89   :  { %v37_v16 = vpop.permute.xlu0 %36 }
  0x8a   :  { %v42_v17 = vpop.permute.xlu1 %41  ;;  %v70_v41 = vmul.f32 %v526_v21, %v37_v16 }
  0x8b   :  { %v71_v40 = vmul.f32 %v526_v21, %v42_v17 }
  0x8e   :  { %v86_v18 = vpop.permute.xlu0 %85 }
  0x8f   :  { %v90_v19 = vpop.permute.xlu1 %89  ;;  %v114_v42 = vmul.f32 %v527_v20, %v86_v18 }
  0x90   :  { %v115_v38 = vmul.f32 %v527_v20, %v90_v19 }
  0x91   :  { %v122_v47 = vadd.f32 %v114_v42, %v70_v41 }
  0x92   :  { %v94_v22 = vpop.permute.xlu0 %93  ;;  %v123_v45 = vadd.f32 %v115_v38, %v71_v40 }
  0x93   :  { %v116_v57 = vmul.f32 %v527_v20, %v94_v22 }
  0x94   :  { %v130_v25 = vpop.permute.xlu1 %129 }
  0x95   :  { %v160_v31 = vadd.f32 %v130_v25, %v120_v29  ;;  %v180_v29 = vld [vmem:[%s861_s1 + $0x20] sm:$0xff] }
  0x96   :  { %v102_v28 = vpop.permute.xlu0 %101 }
  0x97   :  { %v168_v36 = vmax.f32 %v160_v31, 0.0  ;;  %v118_v11 = vmul.f32 %v527_v20, %v102_v28  ;;  %v179_v28 = vld [vmem:[%s861_s1 + $0x18] sm:$0xff]  ;;  %v182_v31 = vld [vmem:[%s861_s1 + $0x30] sm:$0xff] }
  0x99   :  { %v47_v30 = vpop.permute.xlu1 %46 }
  0x9a   :  { %v72_v58 = vmul.f32 %v526_v21, %v47_v30  ;;  %v181_v30 = vld [vmem:[%s861_s1 + $0x28] sm:$0xff] }
  0x9b   :  { %v134_v33 = vpop.permute.xlu0 %133 }
  0x9c   :  { %v161_v34 = vadd.f32 %v134_v33, %v121_v32  ;;  %v124_v63 = vadd.f32 %v116_v57, %v72_v58  ;;  %v183_v32 = vld [vmem:[%s861_s1 + $0x38] sm:$0xff]  ;;  %v528_v33 = vld [vmem:[%s861_s1 + $0x40] sm:$0xff] }
  0x9d   :  { %v52_v35 = vpop.permute.xlu1 %51  ;;  %628 = vmatprep.mubr.msk.f32.mxu1 %vm193_vm0, %v528_v33 }
  0x9e   :  { %v169_v37 = vmax.f32 %v161_v34, 0.0  ;;  %v73_v56 = vmul.f32 %v526_v21, %v52_v35  ;;  %v694_v34 = vmov 3  }
  0x9f   :  { %v142_v44 = vpop.permute.xlu0 %141  ;;  %690 = vset.pattern.permute.xlu1 %v694_v34  ;;  %689 = vset.pattern.permute.xlu0 %v694_v34 }
  0xa0   :  { %v640_v39 = vpack.c.bf16 %v169_v37, %v168_v36  ;;  %v163_v46 = vadd.f32 %v142_v44, %v123_v45  ;;  %473 = vperm.xlu1 %690, %v725_v3   ;;  %469 = vperm.xlu0 %689, %v718_v2  }
  0xa2   :  { %v98_v43 = vpop.permute.xlu1 %97  ;;  %641 = vmatprep.subr.bf16.mxu0 %v640_v39  ;;  %v171_v50 = vmax.f32 %v163_v46, 0.0 }
  0xa3   :  { %643 = vmatpush3.bf16.msra.mxu0 %v640_v39  ;;  %v117_v55 = vmul.f32 %v527_v20, %v98_v43  ;;  %v150_v61 = vpop.permute.xlu0 %149 }
  0xa4   :  { %477 = vperm.xlu1 %690, %v732_v4   ;;  %481 = vperm.xlu0 %689, %v737_v5  }
  0xa5   :  { %v125_v59 = vadd.f32 %v117_v55, %v73_v56 }
  0xa7   :  { %v138_v48 = vpop.permute.xlu1 %137  ;;  %v165_v62 = vadd.f32 %v150_v61, %v125_v59 }
  0xa8   :  { %v162_v49 = vadd.f32 %v138_v48, %v122_v47  ;;  %485 = vperm.xlu1 %690, %v746_v6   ;;  %489 = vperm.xlu0 %689, %v760_v9   ;;  %v529_v47 = vld [vmem:[%s861_s1 + $0x48] sm:$0xff]  ;;  %v530_v48 = vld [vmem:[%s861_s1 + $0x50] sm:$0xff] }
  0xa9   :  { %v173_v12 = vmax.f32 %v165_v62, 0.0 }
  0xaa   :  { %v170_v51 = vmax.f32 %v162_v49, 0.0  ;;  %v531_v49 = vld [vmem:[%s861_s1 + $0x58] sm:$0xff] }
  0xac   :  { %v644_v52 = vpack.c.bf16 %v171_v50, %v170_v51  ;;  %v57_v53 = vpop.permute.xlu1 %56  ;;  %493 = vperm.xlu1 %690, %v752_v8   ;;  %497 = vperm.xlu0 %689, %v772_v10   ;;  %v532_v50 = vld [vmem:[%s861_s1 + $0x60] sm:$0xff]  ;;  %v533_v51 = vld [vmem:[%s861_s1 + $0x68] sm:$0xff] }
  0xad   :  { %v74_v1 = vmul.f32 %v526_v21, %v57_v53  ;;  %v535_v53 = vld [vmem:[%s861_s1 + $0x78] sm:$0xff] }
  0xae   :  { %645 = vmatprep.subr.bf16.mxu0 %v644_v52 }
  0xaf   :  { %647 = vmatpush3.bf16.msra.mxu0 %v644_v52  ;;  %v126_v18 = vadd.f32 %v118_v11, %v74_v1  ;;  %v534_v52 = vld [vmem:[%s861_s1 + $0x70] sm:$0xff] }
  0xb0   :  { %v62_v54 = vpop.permute.xlu1 %61 }
  0xb1   :  { %v75_v16 = vmul.f32 %v526_v21, %v62_v54  ;;  %v178_v21 = vld [vmem:[%s861_s1 + $0x10] sm:$0xff] }
  0xb5   :  { %v106_v60 = vpop.permute.xlu1 %105 }
  0xb6   :  { %v119_v13 = vmul.f32 %v527_v20, %v106_v60  ;;  %v177_v20 = vld [vmem:[%s861_s1 + $0x8] sm:$0xff] }
  0xb8   :  { %v127_v22 = vadd.f32 %v119_v13, %v75_v16 }
  0xba   :  { %v146_v0 = vpop.permute.xlu1 %145 }
  0xbb   :  { %v164_v7 = vadd.f32 %v146_v0, %v124_v63 }
  0xbd   :  { %v172_v14 = vmax.f32 %v164_v7, 0.0 }
  0xbe   :  { %v154_v15 = vpop.permute.xlu1 %153 }
  0xbf   :  { %v648_v17 = vpack.c.bf16 %v173_v12, %v172_v14  ;;  %v166_v19 = vadd.f32 %v154_v15, %v126_v18 }
  0xc1   :  { %649 = vmatprep.subr.bf16.mxu0 %v648_v17  ;;  %v174_v25 = vmax.f32 %v166_v19, 0.0 }
  0xc2   :  { %v158_v23 = vpop.permute.xlu1 %157  ;;  %651 = vmatpush3.bf16.msra.mxu0 %v648_v17 }
  0xc3   :  { %v167_v24 = vadd.f32 %v158_v23, %v127_v22 }
  0xc5   :  { %v175_v26 = vmax.f32 %v167_v24, 0.0 }
  0xc7   :  { %v652_v27 = vpack.c.bf16 %v175_v26, %v174_v25 }
  0xc9   :  { %653 = vmatprep.subr.bf16.mxu0 %v652_v27 }
  0xca   :  { %655 = vmatpush3.bf16.msra.mxu0 %v652_v27 }
  0xcd   :  { %601 = vmatmul.mubr.msk.f32.vlgmr.msra.gmra.mrb[0].mxu0 %vm193_vm0, %v177_v20 }
  0xce   :  { %603 = vmatprep.mubr.msk.f32.mxu0 %vm193_vm0, %v178_v21 }
  0xd1   :  { %604 = vmatmul.mubr.msk.f32.gmra.mrb[2].mxu0 %vm193_vm0, %v179_v28 }
  0xd2   :  { %606 = vmatprep.mubr.msk.f32.mxu0 %vm193_vm0, %v180_v29 }
  0xd5   :  { %607 = vmatmul.mubr.msk.f32.gmra.mrb[4].mxu0 %vm193_vm0, %v181_v30 }
  0xd6   :  { %609 = vmatprep.mubr.msk.f32.mxu0 %vm193_vm0, %v182_v31 }
  0xd9   :  { %610 = vmatmul.mubr.msk.f32.gmra.mrb[6].mxu0 %vm193_vm0, %v183_v32 }
 0x11f   :  { %v474_v54 = vpop.permute.xlu1 %473  ;;  %v470_v55 = vpop.permute.xlu0 %469 }
 0x123   :  { %v478_v60 = vpop.permute.xlu1 %477  ;;  %v482_v0 = vpop.permute.xlu0 %481 }
 0x127   :  { %v486_v15 = vpop.permute.xlu1 %485  ;;  %v490_v23 = vpop.permute.xlu0 %489 }
 0x12b   :  { %v494_v30 = vpop.permute.xlu1 %493  ;;  %v498_v33 = vpop.permute.xlu0 %497 }
 0x1a0   :  { %v602_v35 = vpop.f32.mrb[0].mxu0 }
 0x1a1   :  { %v324_v36 = vmax.f32 %v602_v35, 0.0  ;;  %v284_v37 = vpop.f32.mrb[1].mxu0 }
 0x1a2   :  { %v323_v38 = vmax.f32 %v284_v37, 0.0 }
 0x1a4   :  { %v605_v39 = vpop.f32.mrb[2].mxu0  ;;  %v656_v3 = vpack.c.bf16 %v324_v36, %v323_v38 }
 0x1a5   :  { %v326_v40 = vmax.f32 %v605_v39, 0.0  ;;  %v294_v2 = vpop.f32.mrb[3].mxu0 }
 0x1a6   :  { %v325_v41 = vmax.f32 %v294_v2, 0.0  ;;  %657 = vmatprep.subr.bf16.mxu1 %v656_v3 }
 0x1a7   :  { %659 = vmatpush3.bf16.msra.mxu1 %v656_v3 }
 0x1a8   :  { %v660_v4 = vpack.c.bf16 %v326_v40, %v325_v41  ;;  %v608_v5 = vpop.f32.mrb[4].mxu0 }
 0x1a9   :  { %v328_v6 = vmax.f32 %v608_v5, 0.0  ;;  %v304_v42 = vpop.f32.mrb[5].mxu0 }
 0x1aa   :  { %v327_v9 = vmax.f32 %v304_v42, 0.0  ;;  %661 = vmatprep.subr.bf16.mxu1 %v660_v4 }
 0x1ab   :  { %663 = vmatpush3.bf16.msra.mxu1 %v660_v4 }
 0x1ac   :  { %v664_v8 = vpack.c.bf16 %v328_v6, %v327_v9  ;;  %v611_v10 = vpop.f32.mrb[6].mxu0 }
 0x1ad   :  { %v330_v43 = vmax.f32 %v611_v10, 0.0  ;;  %v314_v44 = vpop.f32.mrb[7].mxu0 }
 0x1ae   :  { %v329_v45 = vmax.f32 %v314_v44, 0.0  ;;  %665 = vmatprep.subr.bf16.mxu1 %v664_v8 }
 0x1af   :  { %667 = vmatpush3.bf16.msra.mxu1 %v664_v8 }
 0x1b0   :  { %v668_v46 = vpack.c.bf16 %v330_v43, %v329_v45 }
 0x1b2   :  { %669 = vmatprep.subr.bf16.mxu1 %v668_v46 }
 0x1b3   :  { %671 = vmatpush3.bf16.msra.mxu1 %v668_v46 }
 0x1b6   :  { %629 = vmatmul.mubr.msk.f32.vlgmr.msra.gmra.mrb[0].mxu1 %vm193_vm0, %v529_v47 }
 0x1b7   :  { %631 = vmatprep.mubr.msk.f32.mxu1 %vm193_vm0, %v530_v48 }
 0x1ba   :  { %632 = vmatmul.mubr.msk.f32.gmra.mrb[2].mxu1 %vm193_vm0, %v531_v49 }
 0x1bb   :  { %634 = vmatprep.mubr.msk.f32.mxu1 %vm193_vm0, %v532_v50 }
 0x1be   :  { %635 = vmatmul.mubr.msk.f32.gmra.mrb[4].mxu1 %vm193_vm0, %v533_v51 }
 0x1bf   :  { %637 = vmatprep.mubr.msk.f32.mxu1 %vm193_vm0, %v534_v52 }
 0x1c2   :  { %638 = vmatmul.mubr.msk.f32.gmra.mrb[6].mxu1 %vm193_vm0, %v535_v53 }
 0x289   :  { %v630_v56 = vpop.f32.mrb[0].mxu1 }
 0x28a   :  { %v461_v57 = vmax.f32 %v630_v56, 0.0  ;;  %v421_v58 = vpop.f32.mrb[1].mxu1 }
 0x28b   :  { %v460_v59 = vmax.f32 %v421_v58, 0.0 }
 0x28c   :  { %v501_v61 = vmul.f32 %v474_v54, %v461_v57 }
 0x28d   :  { %v500_v62 = vmul.f32 %v470_v55, %v460_v59  ;;  %v633_v63 = vpop.f32.mrb[2].mxu1 }
 0x28e   :  { %v431_v1 = vpop.f32.mrb[3].mxu1  ;;  %v463_v11 = vmax.f32 %v633_v63, 0.0 }
 0x28f   :  { %v508_v7 = vadd.f32 %v501_v61, %v500_v62  ;;  %v462_v12 = vmax.f32 %v431_v1, 0.0 }
 0x290   :  { %v503_v17 = vmul.f32 %v482_v0, %v463_v11 }
 0x291   :  { %v502_v13 = vmul.f32 %v478_v60, %v462_v12  ;;  %v636_v14 = vpop.f32.mrb[4].mxu1 }
 0x292   :  { %v441_v16 = vpop.f32.mrb[5].mxu1  ;;  %v465_v19 = vmax.f32 %v636_v14, 0.0 }
 0x293   :  { %v509_v18 = vadd.f32 %v508_v7, %v502_v13  ;;  %v464_v22 = vmax.f32 %v441_v16, 0.0 }
 0x294   :  { %v505_v20 = vmul.f32 %v490_v23, %v465_v19 }
 0x295   :  { %v504_v24 = vmul.f32 %v486_v15, %v464_v22  ;;  %v510_v25 = vadd.f32 %v509_v18, %v503_v17  ;;  %v639_v26 = vpop.f32.mrb[6].mxu1 }
 0x296   :  { %v451_v27 = vpop.f32.mrb[7].mxu1  ;;  %v467_v28 = vmax.f32 %v639_v26, 0.0 }
 0x297   :  { %v511_v21 = vadd.f32 %v510_v25, %v504_v24  ;;  %v466_v29 = vmax.f32 %v451_v27, 0.0 }
 0x298   :  { %v507_v34 = vmul.f32 %v498_v33, %v467_v28 }
 0x299   :  { %v506_v31 = vmul.f32 %v494_v30, %v466_v29  ;;  %v512_v32 = vadd.f32 %v511_v21, %v505_v20 }
 0x29b   :  { %v513_v35 = vadd.f32 %v512_v32, %v506_v31 }
 0x29d   :  { %v514_v36 = vadd.f32 %v513_v35, %v507_v34 }
 0x29f   :  { %v515_v37 = vrot.slane %v514_v36, 4 }
 0x2a1   :  { %v516_v38 = vadd.f32 %v515_v37, %v514_v36 }
 0x2a3   :  { %v517_v39 = vrot.slane %v516_v38, 2 }
 0x2a5   :  { %v518_v3 = vadd.f32 %v517_v39, %v516_v38 }
 0x2a7   :  { %v519_v40 = vrot.slane %v518_v3, 1 }
 0x2a9   :  { %v520_v2 = vadd.f32 %v519_v40, %v518_v3 }
 0x2ab   :  { %521 = vst [vmem:[%s863_s3] sm:$0x1] %v520_v2 }

</bundles_post_ra>
